<compile_context>
chip_gen: v7x
topology: tpu7x:2x2x1
jax: 0.10.0
libtpu: 0.0.40
codegen_flags: <defaults>
</compile_context>

<pallas_src>
import functools

import jax
import jax.numpy as jnp
from jax.experimental import pallas as pl
from jax.experimental.pallas import tpu as pltpu

_LANE = 128
_NEG_INF = -1e30


def _round_up(n, m):
    return ((n + m - 1) // m) * m


def _choose_tiles(n):
    """Return (padded N, dst-row tile tm [parallel axis], src-col tile tk [reduction axis])."""
    if n <= 64:
        n_pad = _round_up(n, 8)
        return n_pad, n_pad, n_pad        # single block: no per-step overhead for tiny graphs
    if n <= 512:
        n_pad = _round_up(n, 128)
        return n_pad, 128, n_pad          # full-width reduction block (== full dim is legal)
    # Large N: bigger dst tile halves the redundant xsrc/xdst/weight re-DMA and the number of
    # grid steps; tk=1024 keeps the dominant N^2 adj stream near the HBM roofline.
    n_pad = _round_up(n, 1024)
    return n_pad, 512, 1024


# ---------------------------------------------------------------------------
# SAGEConv layer:  out = act( (adj_norm @ x) @ W_l + x @ W_r + b )
# adj_norm rows are pre-scaled by 1/deg, so adj_norm @ x is already the neighbor mean.
# grid = (dst row blocks, src col blocks); src axis is the reduction axis (last, "arbitrary").
# ---------------------------------------------------------------------------
def _sage_kernel(adj_ref, xsrc_ref, xdst_ref, wl_ref, wr_ref, b_ref, out_ref,
                 acc_ref, *, activation):
    k = pl.program_id(1)

    @pl.when(k == 0)
    def _init():
        acc_ref[...] = jnp.zeros_like(acc_ref)

    # bf16 x bf16 -> f32 on the MXU; no per-step cast or degree reduction.
    acc_ref[...] += jnp.dot(adj_ref[...], xsrc_ref[...],
                            preferred_element_type=jnp.float32)

    @pl.when(k == pl.num_programs(1) - 1)
    def _epilogue():
        mean = acc_ref[...].astype(jnp.bfloat16)               # (TM, F_in)
        out = (jnp.dot(mean, wl_ref[...], preferred_element_type=jnp.float32)
               + jnp.dot(xdst_ref[...], wr_ref[...], preferred_element_type=jnp.float32)
               + b_ref[...])                                    # bias add in f32
        if activation == "relu":
            out = jnp.maximum(out, 0.0)
        # TODO(synk): F.dropout(p=self.dropout) is a no-op since dropout == 0.0.
        out_ref[...] = out.astype(out_ref.dtype)                # bf16 store for hidden layers


# ---------------------------------------------------------------------------
# Last SAGEConv layer fused with the hyperbolic head:
#   x2 = (adj_norm @ x) @ W_l + x @ W_r + b
#   o  = flatten(outer(x2, x2))          ;  manifold maps at c = 0 -> identity
#   out = log_softmax(o @ W_head + b_head)
# The outer product + head Linear are folded into C small matmuls (no flat C*C buffer).
# ---------------------------------------------------------------------------
def _sage_head_kernel(adj_ref, xsrc_ref, xdst_ref, wl_ref, wr_ref, b_ref,
                      w_head_ref, b_head_ref, out_ref, acc_ref, *, num_classes):
    k = pl.program_id(1)

    @pl.when(k == 0)
    def _init():
        acc_ref[...] = jnp.zeros_like(acc_ref)

    acc_ref[...] += jnp.dot(adj_ref[...], xsrc_ref[...],
                            preferred_element_type=jnp.float32)

    @pl.when(k == pl.num_programs(1) - 1)
    def _epilogue():
        mean = acc_ref[...].astype(jnp.bfloat16)
        x2 = (jnp.dot(mean, wl_ref[...], preferred_element_type=jnp.float32)
              + jnp.dot(xdst_ref[...], wr_ref[...], preferred_element_type=jnp.float32)
              + b_ref[...])                                     # (TM, C) f32

        # Row-wise outer product fused with the head Linear, accumulated as
        #   h = b_head + sum_a (x2 * x2[:, a]) @ W_head[a]   with W_head reshaped to (C, C, Cp).
        # PoincareBall proj / logmap0 / proj_tan0 / expmap0 at curvature c == 0 reduce to the
        # identity (Euclidean limit).
        # TODO(synk): implement the true c > 0 Poincare maps if a nonzero curvature is used.
        wh = w_head_ref[...]                                    # (C, C, Cp) bf16
        h = b_head_ref[...]                                     # (1, Cp) f32, -1e30 on padding
        for a in range(num_classes):
            scaled = (x2 * x2[:, a:a + 1]).astype(jnp.bfloat16)  # (TM, C)
            h = h + jnp.dot(scaled, wh[a], preferred_element_type=jnp.float32)

        # log_softmax in f32 (padded class columns hold ~-1e30 and contribute exp(.) == 0)
        mx = jnp.max(h, axis=-1, keepdims=True)
        s = h - mx
        out_ref[...] = s - jnp.log(jnp.sum(jnp.exp(s), axis=-1, keepdims=True))


# ---------------------------------------------------------------------------
# Wrappers
# ---------------------------------------------------------------------------
def _conv_in_specs(tm, tk, f_in, f_out):
    # TODO(synk): single-buffer (pipeline_mode=pl.Buffered(1)) the grid-invariant W/b streams
    # once buffer_count=1 support is confirmed on the target jax version; double-buffering them
    # only costs a few hundred KiB of VMEM at these widths.
    return [
        pl.BlockSpec((tm, tk), lambda i, k: (i, k)),        # adj_norm tile (dst rows, src cols)
        pl.BlockSpec((tk, f_in), lambda i, k: (k, 0)),      # x, source rows       (bf16)
        pl.BlockSpec((tm, f_in), lambda i, k: (i, 0)),      # x, destination rows  (bf16)
        pl.BlockSpec((f_in, f_out), lambda i, k: (0, 0)),   # W_l (bf16)
        pl.BlockSpec((f_in, f_out), lambda i, k: (0, 0)),   # W_r (bf16)
        pl.BlockSpec((1, f_out), lambda i, k: (0, 0)),      # bias (f32)
    ]


_COMPILER_PARAMS = pltpu.CompilerParams(
    dimension_semantics=("parallel", "arbitrary"),
    # 48 MiB is within physical VMEM on every generation (v5e/v6e: 128 MiB, v7x: 64 MiB) and
    # far above what the largest tile plan (tm=512, tk=1024, bf16) actually needs (~3 MiB).
    vmem_limit_bytes=48 * 1024 * 1024,
)


def sage_conv(x, adj_norm, w_l, w_r, b, *, activation, tm, tk):
    n_pad = adj_norm.shape[0]
    f_in = x.shape[1]
    f_out = w_l.shape[1]
    grid = (n_pad // tm, adj_norm.shape[1] // tk)
    kernel = functools.partial(_sage_kernel, activation=activation)
    return pl.pallas_call(
        kernel,
        out_shape=jax.ShapeDtypeStruct((n_pad, f_out), jnp.bfloat16),   # bf16 intermediate
        grid_spec=pltpu.PrefetchScalarGridSpec(
            num_scalar_prefetch=0,
            grid=grid,
            in_specs=_conv_in_specs(tm, tk, f_in, f_out),
            out_specs=pl.BlockSpec((tm, f_out), lambda i, k: (i, 0)),
            scratch_shapes=[pltpu.VMEM((tm, f_in), jnp.float32)],
        ),
        compiler_params=_COMPILER_PARAMS,
    )(adj_norm, x, x, w_l, w_r, b)


def sage_conv_head(x, adj_norm, w_l, w_r, b, w_head, b_head, *, tm, tk):
    n_pad = adj_norm.shape[0]
    f_in = x.shape[1]
    c = w_l.shape[1]                # true class count (conv output width)
    cp = w_head.shape[2]            # lane-padded class count (final output width)
    grid = (n_pad // tm, adj_norm.shape[1] // tk)
    kernel = functools.partial(_sage_head_kernel, num_classes=c)
    in_specs = _conv_in_specs(tm, tk, f_in, c) + [
        pl.BlockSpec((c, c, cp), lambda i, k: (0, 0, 0)),   # head weight (C, C, Cp) bf16
        pl.BlockSpec((1, cp), lambda i, k: (0, 0)),         # head bias (-1e30 on padded classes)
    ]
    return pl.pallas_call(
        kernel,
        out_shape=jax.ShapeDtypeStruct((n_pad, cp), jnp.float32),
        grid_spec=pltpu.PrefetchScalarGridSpec(
            num_scalar_prefetch=0,
            grid=grid,
            in_specs=in_specs,
            out_specs=pl.BlockSpec((tm, cp), lambda i, k: (i, 0)),
            scratch_shapes=[pltpu.VMEM((tm, f_in), jnp.float32)],
        ),
        compiler_params=_COMPILER_PARAMS,
    )(adj_norm, x, x, w_l, w_r, b, w_head, b_head)


def sage_hbp_forward(x, adj_norm, conv_params, head_params, *, tm, tk):
    # hidden SAGE layers (relu + dropout(0.0)); layer-2 aggregation needs all layer-1 rows,
    # so the layers stay as separate (but fully gridded/pipelined) pallas_calls.
    h = x
    for p in conv_params[:-1]:
        h = sage_conv(h, adj_norm, p["w_l"], p["w_r"], p["b"], activation="relu", tm=tm, tk=tk)
    last = conv_params[-1]
    # final SAGE layer fused with outer-product head + Linear + log_softmax
    return sage_conv_head(h, adj_norm, last["w_l"], last["w_r"], last["b"],
                          head_params["w"], head_params["b"], tm=tm, tk=tk)


if __name__ == "__main__":
    N, NUM_FEATURES, HIDDEN, NUM_CLASSES, E = 16, 8, 32, 4, 48

    key = jax.random.PRNGKey(0)
    kx, ke1, ke2, k1, k2, k3, k4, k5, k6, k7, k8 = jax.random.split(key, 11)

    n_pad, tm, tk = _choose_tiles(N)
    hid_p = _round_up(HIDDEN, _LANE)          # lane-dense hidden width (32 -> 128)
    cls_p = _round_up(NUM_CLASSES, _LANE)     # lane-dense output width (4 -> 128)

    # node features (padded rows are zero; they have no edges and are sliced away at the end)
    x = jnp.zeros((n_pad, NUM_FEATURES), jnp.float32)
    x = x.at[:N].set(jax.random.normal(kx, (N, NUM_FEATURES), jnp.float32))
    x = x.astype(jnp.bfloat16)                # bf16 activations end-to-end

    # random edge_index (2, E) densified into a mask adj[i, j] = 1 iff edge j -> i, then
    # pre-normalized row-wise by 1/deg so the kernels accumulate the neighbor mean directly.
    # (PyG SAGEConv adds no self loops; the W_r root term covers the node itself.)
    src = jax.random.randint(ke1, (E,), 0, N)
    dst = jax.random.randint(ke2, (E,), 0, N)
    adj = jnp.zeros((n_pad, n_pad), jnp.float32).at[dst, src].set(1.0)
    deg = jnp.sum(adj, axis=1, keepdims=True)
    adj_norm = (adj / jnp.maximum(deg, 1.0)).astype(jnp.bfloat16)
    # TODO(synk): duplicate (src, dst) pairs collapse to a single edge in the dense mask.

    def glorot(k, shape):
        return jax.random.normal(k, shape, jnp.float32) / jnp.sqrt(jnp.float32(shape[0]))

    def pad2(w, rows, cols):
        return jnp.zeros((rows, cols), jnp.float32).at[:w.shape[0], :w.shape[1]].set(w)

    # SAGEConv(F -> HIDDEN): hidden padded to 128 lanes (zero columns stay exactly 0 through relu)
    conv1 = dict(
        w_l=pad2(glorot(k1, (NUM_FEATURES, HIDDEN)), NUM_FEATURES, hid_p).astype(jnp.bfloat16),
        w_r=pad2(glorot(k2, (NUM_FEATURES, HIDDEN)), NUM_FEATURES, hid_p).astype(jnp.bfloat16),
        b=pad2(0.1 * jax.random.normal(k3, (1, HIDDEN), jnp.float32), 1, hid_p),
    )
    # SAGEConv(HIDDEN -> NUM_CLASSES): input rows padded to the padded hidden width
    conv2 = dict(
        w_l=pad2(glorot(k4, (HIDDEN, NUM_CLASSES)), hid_p, NUM_CLASSES).astype(jnp.bfloat16),
        w_r=pad2(glorot(k5, (HIDDEN, NUM_CLASSES)), hid_p, NUM_CLASSES).astype(jnp.bfloat16),
        b=0.1 * jax.random.normal(k6, (1, NUM_CLASSES), jnp.float32),
    )
    # head Linear(C*C -> C): output padded to 128 lanes and reshaped to (C, C, Cp) so the kernel
    # accumulates the outer-product head without materializing a (TM, C*C) flat buffer; padded
    # class bias = -1e30 (f32) so the in-kernel log_softmax over the padded width equals
    # log_softmax over the true classes.
    w_head = pad2(glorot(k7, (NUM_CLASSES * NUM_CLASSES, NUM_CLASSES)),
                  NUM_CLASSES * NUM_CLASSES, cls_p)
    w_head = w_head.reshape(NUM_CLASSES, NUM_CLASSES, cls_p).astype(jnp.bfloat16)
    b_true = 0.1 * jax.random.normal(k8, (NUM_CLASSES,), jnp.float32)
    b_head = jnp.full((1, cls_p), _NEG_INF, jnp.float32).at[0, :NUM_CLASSES].set(b_true)
    head = dict(w=w_head, b=b_head)

    out_padded = sage_hbp_forward(x, adj_norm, [conv1, conv2], head, tm=tm, tk=tk)
    out = jax.block_until_ready(out_padded)[:N, :NUM_CLASSES]

    assert out.shape == (N, NUM_CLASSES)
    assert bool(jnp.all(jnp.isfinite(out)))
    # rows of log_softmax must exp-sum to 1
    assert bool(jnp.allclose(jnp.exp(out).sum(-1), 1.0, atol=1e-4))
    print("KERNEL_OK")
</pallas_src>

<mosaic_0001>
module attributes {stable_mosaic.version = 11 : i64} {
  func.func @_sage_kernel(%arg0: i32, %arg1: i32, %arg2: memref<16x16xbf16, #tpu.memory_space<vmem>>, %arg3: memref<16x8xbf16, #tpu.memory_space<vmem>>, %arg4: memref<16x8xbf16, #tpu.memory_space<vmem>>, %arg5: memref<8x128xbf16, #tpu.memory_space<vmem>>, %arg6: memref<8x128xbf16, #tpu.memory_space<vmem>>, %arg7: memref<1x128xf32, #tpu.memory_space<vmem>>, %arg8: memref<16x128xbf16, #tpu.memory_space<vmem>>, %arg9: memref<16x8xf32, #tpu.memory_space<vmem>>) attributes {dimension_semantics = [#tpu.dimension_semantics<parallel>, #tpu.dimension_semantics<arbitrary>], iteration_bounds = array<i64: 1, 1>, scalar_prefetch = 0 : i64, scratch_operands = 1 : i64, tpu.core_type = #tpu.core_type<tc>, window_params = [{transform_indices = @transform_0, window_bounds = array<i64: 16, 16>}, {transform_indices = @transform_1, window_bounds = array<i64: 16, 8>}, {transform_indices = @transform_2, window_bounds = array<i64: 16, 8>}, {pipeline_mode = #tpu.pipeline_mode<synchronous>, transform_indices = @transform_3, window_bounds = array<i64: 8, 128>}, {pipeline_mode = #tpu.pipeline_mode<synchronous>, transform_indices = @transform_4, window_bounds = array<i64: 8, 128>}, {pipeline_mode = #tpu.pipeline_mode<synchronous>, transform_indices = @transform_5, window_bounds = array<i64: 1, 128>}, {transform_indices = @transform_6, window_bounds = array<i64: 16, 128>}]} {
    %c0_i32 = arith.constant 0 : i32
    %0 = arith.cmpi eq, %arg1, %c0_i32 : i32
    %1 = arith.extui %0 : i1 to i32
    %c0_i32_0 = arith.constant 0 : i32
    %2 = arith.cmpi ne, %1, %c0_i32_0 : i32
    scf.if %2 {
      %cst_10 = arith.constant 0.000000e+00 : f32
      %12 = vector.broadcast %cst_10 : f32 to vector<16x8xf32>
      %c0_11 = arith.constant 0 : index
      %c0_12 = arith.constant 0 : index
      %13 = vector.load %arg9[%c0_11, %c0_12] : memref<16x8xf32, #tpu.memory_space<vmem>>, vector<16x8xf32>
      tpu.vector_store %arg9[%c0_11, %c0_12], %12 {strides = array<i32>} : memref<16x8xf32, #tpu.memory_space<vmem>>, vector<16x8xf32>,
    } else {
    }
    %c0 = arith.constant 0 : index
    %c0_1 = arith.constant 0 : index
    %3 = vector.load %arg9[%c0, %c0_1] : memref<16x8xf32, #tpu.memory_space<vmem>>, vector<16x8xf32>
    %c0_2 = arith.constant 0 : index
    %c0_3 = arith.constant 0 : index
    %4 = vector.load %arg2[%c0_2, %c0_3] : memref<16x16xbf16, #tpu.memory_space<vmem>>, vector<16x16xbf16>
    %c0_4 = arith.constant 0 : index
    %c0_5 = arith.constant 0 : index
    %5 = vector.load %arg3[%c0_4, %c0_5] : memref<16x8xbf16, #tpu.memory_space<vmem>>, vector<16x8xbf16>
    %cst = arith.constant dense<0.000000e+00> : vector<16x8xf32>
    %6 = tpu.matmul %4, %5, %cst {dimension_numbers = #tpu.dot_dimension_numbers<[1], [0], [0], [1], [0, 0, 1, 1], [], []>} : vector<16x16xbf16>, vector<16x8xbf16>, vector<16x8xf32> -> vector<16x8xf32>
    %7 = arith.addf %3, %6 : vector<16x8xf32>
    %c0_6 = arith.constant 0 : index
    %c0_7 = arith.constant 0 : index
    %8 = vector.load %arg9[%c0_6, %c0_7] : memref<16x8xf32, #tpu.memory_space<vmem>>, vector<16x8xf32>
    tpu.vector_store %arg9[%c0_6, %c0_7], %7 {strides = array<i32>} : memref<16x8xf32, #tpu.memory_space<vmem>>, vector<16x8xf32>,
    %c0_i32_8 = arith.constant 0 : i32
    %9 = arith.cmpi eq, %arg1, %c0_i32_8 : i32
    %10 = arith.extui %9 : i1 to i32
    %c0_i32_9 = arith.constant 0 : i32
    %11 = arith.cmpi ne, %10, %c0_i32_9 : i32
    scf.if %11 {
      %c0_10 = arith.constant 0 : index
      %c0_11 = arith.constant 0 : index
      %12 = vector.load %arg9[%c0_10, %c0_11] : memref<16x8xf32, #tpu.memory_space<vmem>>, vector<16x8xf32>
      %13 = arith.truncf %12 : vector<16x8xf32> to vector<16x8xbf16>
      %c0_12 = arith.constant 0 : index
      %c0_13 = arith.constant 0 : index
      %14 = vector.load %arg5[%c0_12, %c0_13] : memref<8x128xbf16, #tpu.memory_space<vmem>>, vector<8x128xbf16>
      %cst_14 = arith.constant dense<0.000000e+00> : vector<16x128xf32>
      %15 = tpu.matmul %13, %14, %cst_14 {dimension_numbers = #tpu.dot_dimension_numbers<[1], [0], [0], [1], [0, 0, 1, 1], [], []>} : vector<16x8xbf16>, vector<8x128xbf16>, vector<16x128xf32> -> vector<16x128xf32>
      %c0_15 = arith.constant 0 : index
      %c0_16 = arith.constant 0 : index
      %16 = vector.load %arg4[%c0_15, %c0_16] : memref<16x8xbf16, #tpu.memory_space<vmem>>, vector<16x8xbf16>
      %c0_17 = arith.constant 0 : index
      %c0_18 = arith.constant 0 : index
      %17 = vector.load %arg6[%c0_17, %c0_18] : memref<8x128xbf16, #tpu.memory_space<vmem>>, vector<8x128xbf16>
      %cst_19 = arith.constant dense<0.000000e+00> : vector<16x128xf32>
      %18 = tpu.matmul %16, %17, %cst_19 {dimension_numbers = #tpu.dot_dimension_numbers<[1], [0], [0], [1], [0, 0, 1, 1], [], []>} : vector<16x8xbf16>, vector<8x128xbf16>, vector<16x128xf32> -> vector<16x128xf32>
      %19 = arith.addf %15, %18 : vector<16x128xf32>
      %c0_20 = arith.constant 0 : index
      %c0_21 = arith.constant 0 : index
      %20 = vector.load %arg7[%c0_20, %c0_21] : memref<1x128xf32, #tpu.memory_space<vmem>>, vector<1x128xf32>
      %21 = vector.broadcast %20 : vector<1x128xf32> to vector<16x128xf32>
      %22 = arith.addf %19, %21 : vector<16x128xf32>
      %cst_22 = arith.constant 0.000000e+00 : f32
      %23 = vector.broadcast %cst_22 : f32 to vector<16x128xf32>
      %24 = arith.maximumf %22, %23 : vector<16x128xf32>
      %25 = arith.truncf %24 : vector<16x128xf32> to vector<16x128xbf16>
      %c0_23 = arith.constant 0 : index
      %c0_24 = arith.constant 0 : index
      %26 = vector.load %arg8[%c0_23, %c0_24] : memref<16x128xbf16, #tpu.memory_space<vmem>>, vector<16x128xbf16>
      tpu.vector_store %arg8[%c0_23, %c0_24], %25 {strides = array<i32>} : memref<16x128xbf16, #tpu.memory_space<vmem>>, vector<16x128xbf16>,
    } else {
    }
    return
  }
  func.func @transform_0(%arg0: i32, %arg1: i32) -> (i32, i32) {
    %c0_i32 = arith.constant 0 : i32
    return %arg0, %arg1 : i32, i32
  }
  func.func @transform_1(%arg0: i32, %arg1: i32) -> (i32, i32) {
    %c0_i32 = arith.constant 0 : i32
    %c0_i32_0 = arith.constant 0 : i32
    return %arg1, %c0_i32 : i32, i32
  }
  func.func @transform_2(%arg0: i32, %arg1: i32) -> (i32, i32) {
    %c0_i32 = arith.constant 0 : i32
    %c0_i32_0 = arith.constant 0 : i32
    return %arg0, %c0_i32 : i32, i32
  }
  func.func @transform_3(%arg0: i32, %arg1: i32) -> (i32, i32) {
    %c0_i32 = arith.constant 0 : i32
    %c0_i32_0 = arith.constant 0 : i32
    %c0_i32_1 = arith.constant 0 : i32
    return %c0_i32, %c0_i32_0 : i32, i32
  }
  func.func @transform_4(%arg0: i32, %arg1: i32) -> (i32, i32) {
    %c0_i32 = arith.constant 0 : i32
    %c0_i32_0 = arith.constant 0 : i32
    %c0_i32_1 = arith.constant 0 : i32
    return %c0_i32, %c0_i32_0 : i32, i32
  }
  func.func @transform_5(%arg0: i32, %arg1: i32) -> (i32, i32) {
    %c0_i32 = arith.constant 0 : i32
    %c0_i32_0 = arith.constant 0 : i32
    %c0_i32_1 = arith.constant 0 : i32
    return %c0_i32, %c0_i32_0 : i32, i32
  }
  func.func @transform_6(%arg0: i32, %arg1: i32) -> (i32, i32) {
    %c0_i32 = arith.constant 0 : i32
    %c0_i32_0 = arith.constant 0 : i32
    return %arg0, %c0_i32 : i32, i32
  }
}

</mosaic_0001>

<bundles_post_ra>
// kernel: tpu_custom_call.1
= control target key start
LH: loop header
LB: loop body
LE: loop exit
PB: predicated region body
PF: predicated region fallthrough
CT: control target
= control target key end

     0   :  { %v318_v1 = vmov 0.0   ;;  %vm319_vm0 = vmmov 0   ;;  %vm49_vm1 = vcmask 130048   ;;  %vm29_vm2 = vcmask 64512   ;;  %s394_s0 = inlined_call_operand.vmem [shape: bf16[16,16], index: 0, kind: input, shape index: {}]   ;;  %s395_s1 = inlined_call_operand.vmem [shape: bf16[16,8], index: 1, kind: input, shape index: {}]   ;;  %s396_s2 = inlined_call_operand.vmem [shape: bf16[16,8], index: 2, kind: input, shape index: {}]   ;;  %s397_s3 = inlined_call_operand.vmem [shape: bf16[8,128], index: 3, kind: input, shape index: {}]   ;;  %s398_s4 = inlined_call_operand.vmem [shape: bf16[8,128], index: 4, kind: input, shape index: {}]   ;;  %s399_s5 = inlined_call_operand.vmem [shape: f32[1,128], index: 5, kind: input, shape index: {}]   ;;  %s400_s6 = inlined_call_operand.hbm [shape: bf16[16,128], index: 6, kind: output, shape index: {}]  }
   0x1   :  { %v291_v0 = vld [vmem:[%s395_s1] sm:$0xff]   ;;  %268 = vmatprep.subr.bf16.mxu0 %v318_v1  ;;  %274 = vmatprep.subr.bf16.mxu1 %v318_v1  ;;  %30 = vst.msk [vmem:[#allocation2] sm:$0xff] %vm29_vm2, %v318_v1  ;;  %31 = vst.msk [vmem:[#allocation2 + $0x8] sm:$0xff] %vm29_vm2, %v318_v1 }
   0x2   :  { %v292_v2 = vld [vmem:[%s394_s0] sm:$0xff]   ;;  %269 = vmatpush3.bf16.msra.mxu0 %v291_v0  ;;  %270 = vmatprep.mubr.msk.bf16.mxu0 %vm319_vm0, %v318_v1 }
   0x3   :  { %280 = vmatprep.subr.bf16.mxu0 %v318_v1  ;;  %276 = vmatprep.mubr.msk.bf16.mxu1 %vm319_vm0, %v318_v1 }
   0x4   :  { %11 = vsyncpa [#allocation4], 0  ;;  %v105_v3 = vld [vmem:[%s397_s3] sm:$0xf]  ;;  %vm117_vm3 = vcmask 1043456  }
   0x5   :  { %271 = vmatmul.mubr.msk.bf16.vlgmr.msra.gmra.mrb[0].mxu0 %vm49_vm1, %v292_v2  ;;  %v108_v4 = vld [vmem:[%s398_s4] sm:$0xf]  ;;  %v166_v5 = vsel %vm117_vm3, %v105_v3, 0  ;;  %s320_s4 = smov [#allocation3]  }
   0x6   :  { %282 = vmatprep.mubr.msk.bf16.mxu0 %vm319_vm0, %v318_v1  ;;  %v119_v6 = vsel %vm117_vm3, %v108_v4, 0  ;;  %v293_v7 = vld [vmem:[%s396_s2] sm:$0xff]   ;;  %281 = vmatpush3.bf16.msra.mxu0 %v166_v5  ;;  %s235_s29 = sshll.u32 %s320_s4, 4  ;;  %s236_s29 = int_to_ptr.vmem [resolvable:$true] %s235_s29 }
   0x7   :  { %275 = vmatpush3.bf16.msra.mxu1 %v119_v6  ;;  %v252_v24 = vld [vmem:[%s399_s5] ss:$0 sm:$0xff]  ;;  %s294_s30 = scalar_lea.vmem %s236_s29, 128  ;;  %p299_p1 = scmp.lt.s32.totalorder %s236_s29, %s236_s29 }
   0x8   :  { %v32_v8 = vld [vmem:[#allocation2] sm:$0xff]  ;;  %v33_v10 = vld [vmem:[#allocation2 + $0x8] sm:$0xff]  ;;  %p295_p0 = scmp.ne.s32.totalorder %s236_s29, %s294_s30  ;;  %p300_p2 = scmp.lt.s32.totalorder %s294_s30, %s294_s30 }
   0xa   :  { %277 = vmatmul.mubr.msk.bf16.vlgmr.msra.gmra.mrb[0].mxu1 %vm29_vm2, %v293_v7  ;;  %p301_p3 = por %p300_p2, %p299_p1 }
   0xc   :  { %p302_p4 = pnand %p301_p3, %p295_p0 }
  0xd8   :  { %v87_v9 = vpop.f32.mrb[0].mxu0 }
  0xd9   :  { %v94_v11 = vadd.f32 %v87_v9, %v32_v8  ;;  %v272_v12 = vpop.f32.mrb[1].mxu0 }
  0xda   :  { %v90_v13 = vpop.f32.mrb[2].mxu0 }
  0xdb   :  { %97 = vst.msk [vmem:[#allocation2] sm:$0xff] %vm29_vm2, %v94_v11  ;;  %v95_v14 = vadd.f32 %v90_v13, %v33_v10  ;;  %v273_v15 = vpop.f32.mrb[3].mxu0 }
  0xdd   :  { %98 = vst.msk [vmem:[#allocation2 + $0x8] sm:$0xff] %vm29_vm2, %v95_v14  ;;  %v155_v19 = vpop.f32.mrb[0].mxu1 }
  0xde   :  { %v278_v20 = vpop.f32.mrb[1].mxu1 }
  0xdf   :  { %v158_v21 = vpop.f32.mrb[2].mxu1 }
  0xe0   :  { %v279_v22 = vpop.f32.mrb[3].mxu1 }
  0xe2   :  { %v102_v16 = vld [vmem:[#allocation2] sm:$0xff] }
  0xe4   :  { %v103_v17 = vld [vmem:[#allocation2 + $0x8] sm:$0xff] }
  0xe5   :  { %v104_v18 = vpack.c.bf16 %v103_v17, %v102_v16 }
  0xe7   :  { %283 = vmatmul.mubr.msk.bf16.vlgmr.msra.gmra.mrb[4].mxu0 %vm29_vm2, %v104_v18 }
 0x1ba   :  { %v202_v23 = vpop.f32.mrb[4].mxu0 }
 0x1bb   :  { %v203_v25 = vadd.f32 %v202_v23, %v155_v19  ;;  %v284_v26 = vpop.f32.mrb[5].mxu0 }
 0x1bc   :  { %v205_v27 = vpop.f32.mrb[6].mxu0 }
 0x1bd   :  { %v216_v28 = vadd.f32 %v252_v24, %v203_v25  ;;  %v206_v29 = vadd.f32 %v205_v27, %v158_v21  ;;  %v285_v30 = vpop.f32.mrb[7].mxu0 }
 0x1bf   :  { %v217_v31 = vadd.f32 %v252_v24, %v206_v29  ;;  %v218_v32 = vmax.f32 %v216_v28, 0.0 }
 0x1c1   :  { %v219_v33 = vmax.f32 %v217_v31, 0.0 }
 0x1c3   :  { %v260_v34 = vpack.c.bf16 %v219_v33, %v218_v32 }
 0x1c5   :  { %261 = vst [vmem:[#allocation3] sm:$0xff] %v260_v34  }
 0x1c6   :  { %305 = shalt.err (!%p302_p4)
}
 0x1c7   :  { %s306_s8 = scalar_lea.hbm %s400_s6, 128 }
 0x1c8   :  { %p307_p5 = scmp.ne.s32.totalorder %s400_s6, %s306_s8  ;;  %p310_p6 = scmp.lt.u32.totalorder %s306_s8, %s400_s6 }
 0x1ca   :  { %p312_p7 = pnand %p310_p6, %p307_p5 }
 0x1cc   :  { %315 = shalt.err (!%p312_p7)
}
 0x1cd   :  { %s321_s13 = smov 64   ;;  %s322_s14 = smov 4  }
 0x1ce   :  { %241 = dma.vmem_to_hbm [thread:$0]  %s236_s29, 128, %s400_s6, [#allocation4], %s321_s13, %s321_s13, %s322_s14  }
 0x1cf   :  { %316 = dma.done.wait [#allocation4], 128  }
 0x1d0   :  { %317 = vsyncadd [#allocation4], 4294967168 }
 0x1d1   :  { %245 = vsyncpa [#allocation4], 1 }

</bundles_post_ra>
